<compile_context>
chip_gen: v6e
topology: v6e:2x2x1
jax: 0.10.0
libtpu: 0.0.40
codegen_flags: <defaults>
</compile_context>

<pallas_src>
import jax
import jax.numpy as jnp
from jax.experimental import pallas as pl
from jax.experimental.pallas import tpu as pltpu


def mlp_kernel(x_ref, w1_ref, b1_ref, w2_ref, b2_ref, o_ref):
    # First Linear (in_dim -> hidden) on the MXU, f32 accumulation.
    h = jnp.dot(x_ref[...], w1_ref[...], preferred_element_type=jnp.float32)
    h = h + b1_ref[...]          # b1 is (1, hidden), broadcasts over batch rows
    h = jnp.maximum(h, 0.0)      # ReLU on the VPU
    # Second Linear (hidden -> 1): W2 is a lane-major (1, hidden) row, so this is
    # a VPU elementwise multiply + XLU lane reduction instead of an N=1 matmul.
    out = jnp.sum(h * w2_ref[...], axis=-1, keepdims=True)
    out = out + b2_ref[0]        # scalar bias from SMEM
    o_ref[...] = out.astype(o_ref.dtype)


def mlp_forward(x, w1, b1, w2, b2, *, tb=None):
    B, in_dim = x.shape
    hidden = w1.shape[1]
    assert w1.shape == (in_dim, hidden)
    assert w2.shape == (hidden, 1)

    # Lane-major W2 row and flattened scalar bias.
    w2_row = w2.reshape(1, hidden)
    b1_row = b1.reshape(1, hidden)
    b2_s = b2.reshape(1)

    # Batch tile: multiple of 8 (sublane), large enough to amortize per-step
    # overhead at scale, small enough to stay well inside VMEM (also on v7x's
    # 64 MiB). For tiny demo batches just take the whole batch as one tile.
    if tb is None:
        tb = B if B <= 512 else 512
    if tb % 8 != 0 and tb != B:
        tb = ((tb + 7) // 8) * 8
    grid_b = pl.cdiv(B, tb)
    Bp = grid_b * tb
    if Bp != B:
        x = jnp.pad(x, ((0, Bp - B), (0, 0)))

    out = pl.pallas_call(
        mlp_kernel,
        out_shape=jax.ShapeDtypeStruct((Bp, 1), x.dtype),
        grid=(grid_b,),
        in_specs=[
            # x tile: pipelined (double-buffered) over the batch grid.
            pl.BlockSpec((tb, in_dim), lambda i: (i, 0)),
            # W1 / b1 / W2-row: same block every step -> stay VMEM-resident.
            pl.BlockSpec((in_dim, hidden), lambda i: (0, 0)),
            pl.BlockSpec((1, hidden), lambda i: (0, 0)),
            pl.BlockSpec((1, hidden), lambda i: (0, 0)),
            # b2 scalar: SMEM, no padded VMEM tile, no extra DMA descriptor.
            pl.BlockSpec(memory_space=pltpu.MemorySpace.SMEM),
        ],
        out_specs=pl.BlockSpec((tb, 1), lambda i: (i, 0)),
        compiler_params=pltpu.CompilerParams(
            dimension_semantics=("parallel",),  # shard batch loop across TCs on v7x
        ),
    )(x, w1, b1_row, w2_row, b2_s)
    return out[:B]


def init_params(key, in_dim, hidden=512):
    # Deterministic init mimicking PyTorch nn.Linear default:
    # U(-1/sqrt(fan_in), 1/sqrt(fan_in)) for both weight and bias.
    k1, k2, k3, k4 = jax.random.split(key, 4)
    bound1 = 1.0 / jnp.sqrt(in_dim)
    w1 = jax.random.uniform(k1, (in_dim, hidden), jnp.float32, -bound1, bound1)
    b1 = jax.random.uniform(k2, (1, hidden), jnp.float32, -bound1, bound1)
    bound2 = 1.0 / jnp.sqrt(hidden)
    w2 = jax.random.uniform(k3, (hidden, 1), jnp.float32, -bound2, bound2)
    b2 = jax.random.uniform(k4, (1, 1), jnp.float32, -bound2, bound2)
    return w1, b1, w2, b2


if __name__ == "__main__":
    key = jax.random.PRNGKey(0)
    kx, kp = jax.random.split(key)

    B, in_dim = 8, 32
    x = jax.random.normal(kx, (B, in_dim), jnp.float32)
    w1, b1, w2, b2 = init_params(kp, in_dim)

    # TODO(synk): training-mode Dropout(0.5) not implemented; forward matches eval() semantics.
    out = mlp_forward(x, w1, b1, w2, b2)
    jax.block_until_ready(out)

    # Reference check in plain JAX.
    ref = jnp.maximum(x @ w1 + b1, 0.0) @ w2 + b2
    assert out.shape == (B, 1)
    assert jnp.allclose(out, ref, atol=1e-5, rtol=1e-5)

    print("KERNEL_OK")
</pallas_src>

<mosaic_0001>
module attributes {stable_mosaic.version = 11 : i64} {
  func.func @mlp_kernel(%arg0: i32, %arg1: memref<8x32xf32, #tpu.memory_space<vmem>>, %arg2: memref<32x512xf32, #tpu.memory_space<vmem>>, %arg3: memref<1x512xf32, #tpu.memory_space<vmem>>, %arg4: memref<1x512xf32, #tpu.memory_space<vmem>>, %arg5: memref<1xf32, #tpu.memory_space<smem>>, %arg6: memref<8x1xf32, #tpu.memory_space<vmem>>) attributes {dimension_semantics = [#tpu.dimension_semantics<parallel>], iteration_bounds = array<i64: 1>, scalar_prefetch = 0 : i64, scratch_operands = 0 : i64, tpu.core_type = #tpu.core_type<tc>, window_params = [{transform_indices = @transform_0, window_bounds = array<i64: 8, 32>}, {pipeline_mode = #tpu.pipeline_mode<synchronous>, transform_indices = @transform_1, window_bounds = array<i64: 32, 512>}, {pipeline_mode = #tpu.pipeline_mode<synchronous>, transform_indices = @transform_2, window_bounds = array<i64: 1, 512>}, {pipeline_mode = #tpu.pipeline_mode<synchronous>, transform_indices = @transform_3, window_bounds = array<i64: 1, 512>}, {transform_indices = @transform_4, window_bounds = array<i64: 1>}, {transform_indices = @transform_5, window_bounds = array<i64: 8, 1>}]} {
    %c0 = arith.constant 0 : index
    %c0_0 = arith.constant 0 : index
    %0 = vector.load %arg1[%c0, %c0_0] : memref<8x32xf32, #tpu.memory_space<vmem>>, vector<8x32xf32>
    %c0_1 = arith.constant 0 : index
    %c0_2 = arith.constant 0 : index
    %1 = vector.load %arg2[%c0_1, %c0_2] : memref<32x512xf32, #tpu.memory_space<vmem>>, vector<32x512xf32>
    %cst = arith.constant dense<0.000000e+00> : vector<8x512xf32>
    %2 = tpu.matmul %0, %1, %cst {dimension_numbers = #tpu.dot_dimension_numbers<[1], [0], [0], [1], [0, 0, 1, 1], [], []>} : vector<8x32xf32>, vector<32x512xf32>, vector<8x512xf32> -> vector<8x512xf32>
    %c0_3 = arith.constant 0 : index
    %c0_4 = arith.constant 0 : index
    %3 = vector.load %arg3[%c0_3, %c0_4] : memref<1x512xf32, #tpu.memory_space<vmem>>, vector<1x512xf32>
    %4 = vector.broadcast %3 : vector<1x512xf32> to vector<8x512xf32>
    %5 = arith.addf %2, %4 : vector<8x512xf32>
    %cst_5 = arith.constant 0.000000e+00 : f32
    %6 = vector.broadcast %cst_5 : f32 to vector<8x512xf32>
    %7 = arith.maximumf %5, %6 : vector<8x512xf32>
    %c0_6 = arith.constant 0 : index
    %c0_7 = arith.constant 0 : index
    %8 = vector.load %arg4[%c0_6, %c0_7] : memref<1x512xf32, #tpu.memory_space<vmem>>, vector<1x512xf32>
    %9 = vector.broadcast %8 : vector<1x512xf32> to vector<8x512xf32>
    %10 = arith.mulf %7, %9 : vector<8x512xf32>
    %cst_8 = arith.constant dense<0.000000e+00> : vector<8xf32>
    %11 = vector.multi_reduction <add>, %10, %cst_8 [1] : vector<8x512xf32> to vector<8xf32>
    %12 = vector.shape_cast %11 : vector<8xf32> to vector<8x1xf32>
    %c0_9 = arith.constant 0 : index
    %13 = memref.load %arg5[%c0_9] : memref<1xf32, #tpu.memory_space<smem>>
    %14 = vector.broadcast %13 : f32 to vector<8x1xf32>
    %15 = arith.addf %12, %14 : vector<8x1xf32>
    %c0_10 = arith.constant 0 : index
    %c0_11 = arith.constant 0 : index
    %16 = vector.load %arg6[%c0_10, %c0_11] : memref<8x1xf32, #tpu.memory_space<vmem>>, vector<8x1xf32>
    tpu.vector_store %arg6[%c0_10, %c0_11], %15 {strides = array<i32>} : memref<8x1xf32, #tpu.memory_space<vmem>>, vector<8x1xf32>,
    return
  }
  func.func @transform_0(%arg0: i32) -> (i32, i32) {
    %c0_i32 = arith.constant 0 : i32
    %c0_i32_0 = arith.constant 0 : i32
    return %arg0, %c0_i32 : i32, i32
  }
  func.func @transform_1(%arg0: i32) -> (i32, i32) {
    %c0_i32 = arith.constant 0 : i32
    %c0_i32_0 = arith.constant 0 : i32
    %c0_i32_1 = arith.constant 0 : i32
    return %c0_i32, %c0_i32_0 : i32, i32
  }
  func.func @transform_2(%arg0: i32) -> (i32, i32) {
    %c0_i32 = arith.constant 0 : i32
    %c0_i32_0 = arith.constant 0 : i32
    %c0_i32_1 = arith.constant 0 : i32
    return %c0_i32, %c0_i32_0 : i32, i32
  }
  func.func @transform_3(%arg0: i32) -> (i32, i32) {
    %c0_i32 = arith.constant 0 : i32
    %c0_i32_0 = arith.constant 0 : i32
    %c0_i32_1 = arith.constant 0 : i32
    return %c0_i32, %c0_i32_0 : i32, i32
  }
  func.func @transform_4(%arg0: i32) -> i32 {
    %c0_i32 = arith.constant 0 : i32
    %c0_i32_0 = arith.constant 0 : i32
    return %c0_i32 : i32
  }
  func.func @transform_5(%arg0: i32) -> (i32, i32) {
    %c0_i32 = arith.constant 0 : i32
    %c0_i32_0 = arith.constant 0 : i32
    return %arg0, %c0_i32 : i32, i32
  }
}

</mosaic_0001>

<bundles_post_ra>
// kernel: tpu_custom_call.1
= control target key start
LH: loop header
LB: loop body
LE: loop exit
PB: predicated region body
PF: predicated region fallthrough
CT: control target
= control target key end

     0   :  { %11 = vsyncpa [#allocation4], 0  ;;  %s415_s0 = inlined_call_operand.hbm [shape: f32[8,32], index: 0, kind: input, shape index: {}]   ;;  %s416_s1 = inlined_call_operand.hbm [shape: f32[32,512], index: 1, kind: input, shape index: {}]   ;;  %s417_s2 = inlined_call_operand.vmem [shape: f32[1,512], index: 2, kind: input, shape index: {}]   ;;  %s418_s3 = inlined_call_operand.hbm [shape: f32[1,512], index: 3, kind: input, shape index: {}]   ;;  %s419_s4 = inlined_call_operand.<no memory space> [shape: f32[1], index: 4, kind: input, shape index: {}]   ;;  %s420_s5 = inlined_call_operand.vmem [shape: f32[8,1], index: 5, kind: output, shape index: {}]  }
   0x1   :  { %12 = vsyncpa [#allocation6], 0  ;;  %s361_s18 = smov [#allocation5]  }
   0x2   :  { %s28_s19 = sshll.u32 %s361_s18, 4  ;;  %s29_s19 = int_to_ptr.vmem [resolvable:$true] %s28_s19 }
   0x3   :  { %s305_s20 = scalar_lea.vmem %s29_s19, 2048  ;;  %p310_p1 = scmp.lt.s32.totalorder %s29_s19, %s29_s19 }
   0x4   :  { %p306_p0 = scmp.ne.s32.totalorder %s29_s19, %s305_s20  ;;  %p311_p2 = scmp.lt.s32.totalorder %s305_s20, %s305_s20 }
   0x6   :  { %p312_p3 = por %p311_p2, %p310_p1 }
   0x8   :  { %p313_p4 = pnand %p312_p3, %p306_p0 }
   0xa   :  { %316 = shalt.err (!%p313_p4)
}
   0xb   :  { %s362_s21 = smov 512   ;;  %s363_s22 = smov 32  }
   0xc   :  { %34 = dma.hbm_to_vmem [thread:$0]  %s416_s1, 2048, %s29_s19, [#allocation6], %s362_s21, %s362_s21, %s363_s22  }
   0xd   :  { %s364_s25 = smov [#allocation3]   ;;  %s365_s27 = smov [#allocation7]  }
   0xe   :  { %s19_s26 = sshll.u32 %s364_s25, 4  ;;  %s43_s28 = sshll.u32 %s365_s27, 4  ;;  %s20_s26 = int_to_ptr.vmem [resolvable:$true] %s19_s26  ;;  %s44_s28 = int_to_ptr.vmem [resolvable:$true] %s43_s28 }
   0xf   :  { %s325_s29 = scalar_lea.vmem %s20_s26, 128  ;;  %p330_p6 = scmp.lt.s32.totalorder %s20_s26, %s20_s26 }
  0x10   :  { %p326_p5 = scmp.ne.s32.totalorder %s20_s26, %s325_s29  ;;  %p331_p7 = scmp.lt.s32.totalorder %s325_s29, %s325_s29 }
  0x12   :  { %p332_p8 = por %p331_p7, %p330_p6 }
  0x14   :  { %p333_p9 = pnand %p332_p8, %p326_p5 }
  0x16   :  { %336 = shalt.err (!%p333_p9)
}
  0x17   :  { %22 = dma.hbm_to_vmem [thread:$0]  %s415_s0, 128, %s20_s26, [#allocation4]  }
  0x18   :  { %s345_s7 = scalar_lea.vmem %s44_s28, 64  ;;  %p350_p11 = scmp.lt.s32.totalorder %s44_s28, %s44_s28 }
  0x19   :  { %p346_p10 = scmp.ne.s32.totalorder %s44_s28, %s345_s7  ;;  %p351_p12 = scmp.lt.s32.totalorder %s345_s7, %s345_s7 }
  0x1b   :  { %p352_p13 = por %p351_p12, %p350_p11 }
  0x1d   :  { %p353_p0 = pnand %p352_p13, %p346_p10 }
  0x1f   :  { %356 = shalt.err (!%p353_p0)
}
  0x20   :  { %46 = dma.hbm_to_vmem [thread:$0]  %s418_s3, 64, %s44_s28, [#allocation6]  }
  0x21   :  { %357 = dma.done.wait [#allocation4], 128  }
  0x22   :  { %358 = vsyncadd [#allocation4], 4294967168 }
  0x23   :  { %359 = dma.done.wait [#allocation6], 2112  }
  0x24   :  { %360 = vsyncadd [#allocation6], 4294965184  ;;  %v366_v0 = vmov 0.0   ;;  %v72_v1 = vld [vmem:[#allocation5 + $0x68] sm:$0xff]  ;;  %v71_v2 = vld [vmem:[#allocation5 + $0x60] sm:$0xff]  ;;  %vm97_vm0 = vcmask 261120   ;;  %v77_v18 = vlaneseq  ;;  %v279_v53 = vstv %s419_s4 }
  0x25   :  { %165 = vmatprep.mubr.f32.mxu0 %v366_v0  ;;  %236 = vmatprep.mubr.f32.mxu1 %v366_v0  ;;  %v68_v3 = vld [vmem:[#allocation5 + $0x48] sm:$0xff]  ;;  %v74_v4 = vld [vmem:[#allocation5 + $0x78] sm:$0xff]  ;;  %v67_v5 = vld [vmem:[#allocation5 + $0x40] sm:$0xff]  ;;  %vm281_vm1 = vcmask 7168  }
  0x26   :  { %125 = vmatprep.subr.mxu0 %v72_v1  ;;  %v73_v6 = vld [vmem:[#allocation5 + $0x70] sm:$0xff]  ;;  %196 = vmatprep.subr.mxu1 %v74_v4  ;;  %v64_v7 = vld [vmem:[#allocation5 + $0x28] sm:$0xff]  ;;  %v70_v8 = vld [vmem:[#allocation5 + $0x58] sm:$0xff]  ;;  %v78_v19 = vshrl.u32 %v77_v18, 7 }
  0x27   :  { %126 = vmatpush1.msra.mxu0 %v71_v2  ;;  %197 = vmatpush1.msra.mxu1 %v73_v6  ;;  %v63_v9 = vld [vmem:[#allocation5 + $0x20] sm:$0xff]  ;;  %v69_v10 = vld [vmem:[#allocation5 + $0x50] sm:$0xff]  ;;  %v66_v11 = vld [vmem:[#allocation5 + $0x38] sm:$0xff] }
  0x28   :  { %127 = vmatprep.subr.mxu0 %v68_v3  ;;  %198 = vmatprep.subr.mxu1 %v70_v8  ;;  %v60_v12 = vld [vmem:[#allocation5 + $0x8] sm:$0xff]  ;;  %v65_v13 = vld [vmem:[#allocation5 + $0x30] sm:$0xff]  ;;  %v59_v14 = vld [vmem:[#allocation5] sm:$0xff]  ;;  %v79_v20 = vsub.s32 0, %v78_v19  ;;  %v87_v22 = vsub.s32 2, %v78_v19  ;;  %v83_v23 = vsub.s32 1, %v78_v19 }
  0x29   :  { %128 = vmatpush1.msra.mxu0 %v67_v5  ;;  %199 = vmatpush1.msra.mxu1 %v69_v10  ;;  %v62_v15 = vld [vmem:[#allocation5 + $0x18] sm:$0xff]  ;;  %v61_v17 = vld [vmem:[#allocation5 + $0x10] sm:$0xff]  ;;  %v91_v24 = vsub.s32 3, %v78_v19  ;;  %v247_v27 = vld [vmem:[#allocation7] sm:$0xf] }
  0x2a   :  { %129 = vmatprep.subr.mxu0 %v64_v7  ;;  %200 = vmatprep.subr.mxu1 %v66_v11  ;;  %v58_v16 = vld [vmem:[#allocation3] sm:$0xff]  ;;  %v252_v33 = vrot.slane %v247_v27, %v79_v20  ;;  %v256_v38 = vrot.slane %v247_v27, %v83_v23  ;;  %v260_v39 = vrot.slane %v247_v27, %v87_v22 }
  0x2b   :  { %130 = vmatpush1.msra.mxu0 %v63_v9  ;;  %201 = vmatpush1.msra.mxu1 %v65_v13  ;;  %v75_v21 = vld [vmem:[%s417_s2] sm:$0xf]  ;;  %v264_v44 = vrot.slane %v247_v27, %v91_v24 }
  0x2c   :  { %131 = vmatprep.subr.mxu0 %v60_v12  ;;  %202 = vmatprep.subr.mxu1 %v62_v15  ;;  %v80_v25 = vrot.slane %v75_v21, %v79_v20  ;;  %v88_v26 = vrot.slane %v75_v21, %v87_v22  ;;  %v84_v28 = vrot.slane %v75_v21, %v83_v23 }
  0x2d   :  { %132 = vmatpush1.msra.mxu0 %v59_v14  ;;  %203 = vmatpush1.msra.mxu1 %v61_v17  ;;  %v92_v30 = vrot.slane %v75_v21, %v91_v24 }
  0x2e   :  { %289 = vmatmul.mubr.msk.f32.vlgmr.msra.gmra.mxu0 %vm97_vm0, %v58_v16  ;;  %290 = vmatmul.mubr.msk.f32.vlgmr.msra.gmra.mxu1 %vm97_vm0, %v58_v16 }
  0xee   :  { %v167_v29 = vpop.f32.mrf.mxu0  ;;  %v238_v32 = vpop.f32.mrf.mxu1 }
  0xef   :  { %v168_v31 = vadd.f32 %v167_v29, %v80_v25  ;;  %v239_v35 = vadd.f32 %v238_v32, %v88_v26 }
  0xf0   :  { %v169_v34 = vpop.f32.mrf.mxu0  ;;  %v240_v40 = vpop.f32.mrf.mxu1 }
  0xf1   :  { %v243_v36 = vmax.f32 %v168_v31, 0.0  ;;  %v170_v37 = vadd.f32 %v169_v34, %v84_v28  ;;  %v245_v41 = vmax.f32 %v239_v35, 0.0  ;;  %v241_v42 = vadd.f32 %v240_v40, %v92_v30 }
  0xf3   :  { %v244_v43 = vmax.f32 %v170_v37, 0.0  ;;  %v269_v45 = vmul.f32 %v252_v33, %v243_v36  ;;  %v271_v47 = vmul.f32 %v260_v39, %v245_v41  ;;  %v246_v48 = vmax.f32 %v241_v42, 0.0 }
  0xf5   :  { %v270_v46 = vmul.f32 %v256_v38, %v244_v43  ;;  %v272_v50 = vmul.f32 %v264_v44, %v246_v48 }
  0xf7   :  { %v273_v49 = vadd.f32 %v270_v46, %v269_v45 }
  0xf9   :  { %v274_v51 = vadd.f32 %v273_v49, %v271_v47 }
  0xfb   :  { %v275_v52 = vadd.f32 %v274_v51, %v272_v50 }
  0xfd   :  { %276 = vadd.xlane.f32.xlu0 %v275_v52 }
 0x186   :  { %v277_v54 = vpop.xlane.xlu0 %276 }
 0x187   :  { %v280_v55 = vadd.f32 %v279_v53, %v277_v54 }
 0x189   :  { %282 = vst.msk [vmem:[%s420_s5] sm:$0xff] %vm281_vm1, %v280_v55 }
 0x18a   :  { %287 = vsyncpa [#allocation4], 1 }
 0x18b   :  { %288 = vsyncpa [#allocation6], 1 }

</bundles_post_ra>
